<compile_context>
chip_gen: v7x
topology: tpu7x:2x2x1
jax: 0.10.0
libtpu: 0.0.40
codegen_flags: <defaults>
</compile_context>

<pallas_src>
import jax
import jax.numpy as jnp
from jax.experimental import pallas as pl
from jax.experimental.pallas import tpu as pltpu

batch_size = 1
hidden_size = 6
input_size = 6
num_classes = 6
num_layers = 1
sequence_length = 1


def lstm_cell_kernel(x_ref, h_ref, c_ref, w_ih_ref, w_hh_ref, b_ref,
                     scale_ref, offset_ref,
                     hidden_out_ref, out_ref, cell_out_ref):
    """Fused single-step LSTM cell, raw-shaped inputs/outputs.

    x_ref      : (B, T, I)   input, T == 1
    h_ref      : (L, B, H)   previous hidden state, L == 1
    c_ref      : (L, B, H)   previous cell state
    w_ih_ref   : (I, 4H)     w_ih^T, i/f/o columns pre-scaled by 0.5
    w_hh_ref   : (H, 4H)     w_hh^T, i/f/o columns pre-scaled by 0.5
    b_ref      : (1, 4H)     b_ih + b_hh, i/f/o columns pre-scaled by 0.5
    scale_ref  : (1, 4H)     activation scale  (0.5 for i/f/o, 1.0 for g)
    offset_ref : (1, 4H)     activation offset (0.5 for i/f/o, 0.0 for g)
    hidden_out : (L, B, H)   new hidden state
    out_ref    : (B*T, C)    model output (== h_new, since C == H)
    cell_out   : (L, B, H)   new cell state
    """
    H = hidden_size

    x2 = x_ref[...].reshape(batch_size, input_size)   # (B, I)   (T == 1)
    h2 = h_ref[0]                                      # (B, H)   (L == 1)
    c2 = c_ref[0]                                      # (B, H)

    # Two MXU pushes (x and h operands) + bias; no concat anywhere.
    gates = (jnp.dot(x2, w_ih_ref[...], preferred_element_type=jnp.float32)
             + jnp.dot(h2, w_hh_ref[...], preferred_element_type=jnp.float32)
             + b_ref[...])                             # (B, 4H)

    # One EUP launch for all four gates; single FMA fixup maps the pre-scaled
    # i/f/o columns to sigmoid (0.5*tanh(z/2)+0.5) and leaves g as tanh(z).
    t = jnp.tanh(gates)                                # (B, 4H)
    act = scale_ref[...] * t + offset_ref[...]         # (B, 4H)

    # Lane-offset slices (offsets 6/12/18) — minor VPU/XLU cost, negligible at
    # this size compared to launch overhead.
    i_g = act[:, 0 * H:1 * H]
    f_g = act[:, 1 * H:2 * H]
    g_g = act[:, 2 * H:3 * H]
    o_g = act[:, 3 * H:4 * H]

    c_new = f_g * c2 + i_g * g_g                       # (B, H)
    h_new = o_g * jnp.tanh(c_new)                      # (B, H)  (2nd EUP launch)

    # Final-shaped stores: no post-call reshapes/slices needed in the wrapper.
    hidden_out_ref[0] = h_new
    cell_out_ref[0] = c_new
    out_ref[...] = h_new                               # num_classes == hidden_size


def prepare_lstm_params(w_ih, w_hh, b_ih, b_hh):
    """One-time parameter prep (depends only on static weights)."""
    H = hidden_size
    col = jnp.arange(4 * H)
    is_g = (col >= 2 * H) & (col < 3 * H)

    # Pre-scale i/f/o gate rows by 0.5 so the kernel needs a single tanh.
    pre_scale = jnp.where(is_g, 1.0, 0.5).astype(jnp.float32)          # (4H,)
    act_scale = pre_scale.reshape(1, 4 * H)                            # (1, 4H)
    act_offset = jnp.where(is_g, 0.0, 0.5).astype(jnp.float32).reshape(1, 4 * H)

    w_ih_t = (w_ih * pre_scale[:, None]).T.astype(jnp.float32)         # (I, 4H)
    w_hh_t = (w_hh * pre_scale[:, None]).T.astype(jnp.float32)         # (H, 4H)
    bias = ((b_ih + b_hh) * pre_scale).reshape(1, 4 * H).astype(jnp.float32)
    return w_ih_t, w_hh_t, bias, act_scale, act_offset


def lstm_forward(x, hidden, cell, params):
    """Replicates LSTMModel.forward: returns (hidden, out, cell)."""
    w_ih_t, w_hh_t, bias, act_scale, act_offset = params
    B, T, I, H = batch_size, sequence_length, input_size, hidden_size

    x = x.reshape(B, T, I)   # matches the module's x.view(...); no-op if already shaped

    vmem = pl.BlockSpec(memory_space=pltpu.MemorySpace.VMEM)
    hidden_out, out, cell_out = pl.pallas_call(
        lstm_cell_kernel,
        out_shape=(
            jax.ShapeDtypeStruct((num_layers, B, H), jnp.float32),
            jax.ShapeDtypeStruct((B * T, num_classes), jnp.float32),
            jax.ShapeDtypeStruct((num_layers, B, H), jnp.float32),
        ),
        in_specs=[vmem] * 8,
        out_specs=(vmem, vmem, vmem),
    )(x, hidden, cell, w_ih_t, w_hh_t, bias, act_scale, act_offset)
    return hidden_out, out, cell_out


def _lstm_reference(x, hidden, cell, w_ih, w_hh, b_ih, b_hh):
    """Pure-JAX reference of the same PyTorch LSTM step (correctness check)."""
    B, T, I, H = batch_size, sequence_length, input_size, hidden_size
    x2 = x.reshape(B, T, I)[:, 0, :]
    h = hidden.reshape(num_layers, B, H)[0]
    c = cell.reshape(num_layers, B, H)[0]
    gates = x2 @ w_ih.T + h @ w_hh.T + (b_ih + b_hh)[None, :]
    i_g = jax.nn.sigmoid(gates[:, 0 * H:1 * H])
    f_g = jax.nn.sigmoid(gates[:, 1 * H:2 * H])
    g_g = jnp.tanh(gates[:, 2 * H:3 * H])
    o_g = jax.nn.sigmoid(gates[:, 3 * H:4 * H])
    c_new = f_g * c + i_g * g_g
    h_new = o_g * jnp.tanh(c_new)
    return (h_new.reshape(num_layers, B, H),
            h_new.reshape(-1, num_classes),
            c_new.reshape(num_layers, B, H))


if __name__ == "__main__":
    key = jax.random.PRNGKey(0)
    k_x, k_h, k_c, k_wih, k_whh, k_bih, k_bhh = jax.random.split(key, 7)

    # PyTorch default init: U(-1/sqrt(H), 1/sqrt(H)).
    bound = 1.0 / jnp.sqrt(jnp.float32(hidden_size))
    w_ih = jax.random.uniform(k_wih, (4 * hidden_size, input_size),
                              jnp.float32, -bound, bound)
    w_hh = jax.random.uniform(k_whh, (4 * hidden_size, hidden_size),
                              jnp.float32, -bound, bound)
    b_ih = jax.random.uniform(k_bih, (4 * hidden_size,), jnp.float32, -bound, bound)
    b_hh = jax.random.uniform(k_bhh, (4 * hidden_size,), jnp.float32, -bound, bound)

    x = jax.random.normal(k_x, (batch_size, sequence_length, input_size), jnp.float32)
    hidden0 = jax.random.normal(k_h, (num_layers, batch_size, hidden_size), jnp.float32)
    cell0 = jax.random.normal(k_c, (num_layers, batch_size, hidden_size), jnp.float32)

    # One-time parameter prep (hoisted out of the per-step path).
    params = jax.tree.map(jax.block_until_ready,
                          prepare_lstm_params(w_ih, w_hh, b_ih, b_hh))

    hidden_out, out, cell_out = lstm_forward(x, hidden0, cell0, params)
    jax.block_until_ready((hidden_out, out, cell_out))

    assert hidden_out.shape == (num_layers, batch_size, hidden_size)
    assert out.shape == (batch_size * sequence_length, num_classes)
    assert cell_out.shape == (num_layers, batch_size, hidden_size)

    # Numerical check against a pure-JAX reference of the PyTorch semantics.
    h_ref, o_ref, c_ref = _lstm_reference(x, hidden0, cell0, w_ih, w_hh, b_ih, b_hh)
    assert jnp.allclose(hidden_out, h_ref, atol=1e-5, rtol=1e-5)
    assert jnp.allclose(out, o_ref, atol=1e-5, rtol=1e-5)
    assert jnp.allclose(cell_out, c_ref, atol=1e-5, rtol=1e-5)

    print("KERNEL_OK")
</pallas_src>

<mosaic_0001>
module attributes {stable_mosaic.version = 11 : i64} {
  func.func @lstm_cell_kernel(%arg0: memref<1x1x6xf32, #tpu.memory_space<vmem>>, %arg1: memref<1x1x6xf32, #tpu.memory_space<vmem>>, %arg2: memref<1x1x6xf32, #tpu.memory_space<vmem>>, %arg3: memref<6x24xf32, #tpu.memory_space<vmem>>, %arg4: memref<6x24xf32, #tpu.memory_space<vmem>>, %arg5: memref<1x24xf32, #tpu.memory_space<vmem>>, %arg6: memref<1x24xf32, #tpu.memory_space<vmem>>, %arg7: memref<1x24xf32, #tpu.memory_space<vmem>>, %arg8: memref<1x1x6xf32, #tpu.memory_space<vmem>>, %arg9: memref<1x6xf32, #tpu.memory_space<vmem>>, %arg10: memref<1x1x6xf32, #tpu.memory_space<vmem>>) attributes {dimension_semantics = [], scalar_prefetch = 0 : i64, scratch_operands = 0 : i64, tpu.core_type = #tpu.core_type<tc>} {
    %c0 = arith.constant 0 : index
    %c0_0 = arith.constant 0 : index
    %c0_1 = arith.constant 0 : index
    %0 = vector.load %arg0[%c0, %c0_0, %c0_1] : memref<1x1x6xf32, #tpu.memory_space<vmem>>, vector<1x1x6xf32>
    %1 = vector.shape_cast %0 : vector<1x1x6xf32> to vector<1x6xf32>
    %c0_2 = arith.constant 0 : index
    %c0_3 = arith.constant 0 : index
    %c0_4 = arith.constant 0 : index
    %2 = vector.load %arg1[%c0_2, %c0_3, %c0_4] : memref<1x1x6xf32, #tpu.memory_space<vmem>>, vector<1x1x6xf32>
    %3 = vector.shape_cast %2 : vector<1x1x6xf32> to vector<1x6xf32>
    %c0_5 = arith.constant 0 : index
    %c0_6 = arith.constant 0 : index
    %c0_7 = arith.constant 0 : index
    %4 = vector.load %arg2[%c0_5, %c0_6, %c0_7] : memref<1x1x6xf32, #tpu.memory_space<vmem>>, vector<1x1x6xf32>
    %5 = vector.shape_cast %4 : vector<1x1x6xf32> to vector<1x6xf32>
    %c0_8 = arith.constant 0 : index
    %c0_9 = arith.constant 0 : index
    %6 = vector.load %arg3[%c0_8, %c0_9] : memref<6x24xf32, #tpu.memory_space<vmem>>, vector<6x24xf32>
    %cst = arith.constant dense<0.000000e+00> : vector<1x24xf32>
    %7 = tpu.matmul %1, %6, %cst {dimension_numbers = #tpu.dot_dimension_numbers<[1], [0], [0], [1], [0, 0, 1, 1], [], []>} : vector<1x6xf32>, vector<6x24xf32>, vector<1x24xf32> -> vector<1x24xf32>
    %c0_10 = arith.constant 0 : index
    %c0_11 = arith.constant 0 : index
    %8 = vector.load %arg4[%c0_10, %c0_11] : memref<6x24xf32, #tpu.memory_space<vmem>>, vector<6x24xf32>
    %cst_12 = arith.constant dense<0.000000e+00> : vector<1x24xf32>
    %9 = tpu.matmul %3, %8, %cst_12 {dimension_numbers = #tpu.dot_dimension_numbers<[1], [0], [0], [1], [0, 0, 1, 1], [], []>} : vector<1x6xf32>, vector<6x24xf32>, vector<1x24xf32> -> vector<1x24xf32>
    %10 = arith.addf %7, %9 : vector<1x24xf32>
    %c0_13 = arith.constant 0 : index
    %c0_14 = arith.constant 0 : index
    %11 = vector.load %arg5[%c0_13, %c0_14] : memref<1x24xf32, #tpu.memory_space<vmem>>, vector<1x24xf32>
    %12 = arith.addf %10, %11 : vector<1x24xf32>
    %13 = math.tanh %12 : vector<1x24xf32>
    %c0_15 = arith.constant 0 : index
    %c0_16 = arith.constant 0 : index
    %14 = vector.load %arg6[%c0_15, %c0_16] : memref<1x24xf32, #tpu.memory_space<vmem>>, vector<1x24xf32>
    %15 = arith.mulf %14, %13 : vector<1x24xf32>
    %c0_17 = arith.constant 0 : index
    %c0_18 = arith.constant 0 : index
    %16 = vector.load %arg7[%c0_17, %c0_18] : memref<1x24xf32, #tpu.memory_space<vmem>>, vector<1x24xf32>
    %17 = arith.addf %15, %16 : vector<1x24xf32>
    %18 = vector.extract_strided_slice %17 {offsets = [0, 0], sizes = [1, 6], strides = [1, 1]} : vector<1x24xf32> to vector<1x6xf32>
    %19 = vector.extract_strided_slice %17 {offsets = [0, 6], sizes = [1, 6], strides = [1, 1]} : vector<1x24xf32> to vector<1x6xf32>
    %20 = vector.extract_strided_slice %17 {offsets = [0, 12], sizes = [1, 6], strides = [1, 1]} : vector<1x24xf32> to vector<1x6xf32>
    %21 = vector.extract_strided_slice %17 {offsets = [0, 18], sizes = [1, 6], strides = [1, 1]} : vector<1x24xf32> to vector<1x6xf32>
    %22 = arith.mulf %19, %5 : vector<1x6xf32>
    %23 = arith.mulf %18, %20 : vector<1x6xf32>
    %24 = arith.addf %22, %23 : vector<1x6xf32>
    %25 = math.tanh %24 : vector<1x6xf32>
    %26 = arith.mulf %21, %25 : vector<1x6xf32>
    %c0_19 = arith.constant 0 : index
    %c0_20 = arith.constant 0 : index
    %c0_21 = arith.constant 0 : index
    %27 = vector.load %arg8[%c0_19, %c0_20, %c0_21] : memref<1x1x6xf32, #tpu.memory_space<vmem>>, vector<1x1x6xf32>
    %28 = vector.shape_cast %27 : vector<1x1x6xf32> to vector<1x6xf32>
    %29 = vector.shape_cast %26 : vector<1x6xf32> to vector<1x1x6xf32>
    tpu.vector_store %arg8[%c0_19, %c0_20, %c0_21], %29 {strides = array<i32>} : memref<1x1x6xf32, #tpu.memory_space<vmem>>, vector<1x1x6xf32>,
    %c0_22 = arith.constant 0 : index
    %c0_23 = arith.constant 0 : index
    %c0_24 = arith.constant 0 : index
    %30 = vector.load %arg10[%c0_22, %c0_23, %c0_24] : memref<1x1x6xf32, #tpu.memory_space<vmem>>, vector<1x1x6xf32>
    %31 = vector.shape_cast %30 : vector<1x1x6xf32> to vector<1x6xf32>
    %32 = vector.shape_cast %24 : vector<1x6xf32> to vector<1x1x6xf32>
    tpu.vector_store %arg10[%c0_22, %c0_23, %c0_24], %32 {strides = array<i32>} : memref<1x1x6xf32, #tpu.memory_space<vmem>>, vector<1x1x6xf32>,
    %c0_25 = arith.constant 0 : index
    %c0_26 = arith.constant 0 : index
    %33 = vector.load %arg9[%c0_25, %c0_26] : memref<1x6xf32, #tpu.memory_space<vmem>>, vector<1x6xf32>
    tpu.vector_store %arg9[%c0_25, %c0_26], %26 {strides = array<i32>} : memref<1x6xf32, #tpu.memory_space<vmem>>, vector<1x6xf32>,
    return
  }
}

</mosaic_0001>

<bundles_post_ra>
// kernel: tpu_custom_call.1
= control target key start
LH: loop header
LB: loop body
LE: loop exit
PB: predicated region body
PF: predicated region fallthrough
CT: control target
= control target key end

     0   :  { %16 = vsyncpa [#allocation3], 0  ;;  %s624_s0 = inlined_call_operand.hbm [shape: f32[1,1,6], index: 0, kind: input, shape index: {}]   ;;  %s625_s1 = inlined_call_operand.vmem [shape: f32[1,1,6], index: 1, kind: input, shape index: {}]   ;;  %s626_s2 = inlined_call_operand.vmem [shape: f32[1,1,6], index: 2, kind: input, shape index: {}]   ;;  %s627_s3 = inlined_call_operand.vmem [shape: f32[6,24], index: 3, kind: input, shape index: {}]   ;;  %s628_s4 = inlined_call_operand.hbm [shape: f32[6,24], index: 4, kind: input, shape index: {}]   ;;  %s629_s5 = inlined_call_operand.vmem [shape: f32[1,24], index: 5, kind: input, shape index: {}]   ;;  %s630_s6 = inlined_call_operand.vmem [shape: f32[1,24], index: 6, kind: input, shape index: {}]   ;;  %s631_s7 = inlined_call_operand.vmem [shape: f32[1,24], index: 7, kind: input, shape index: {}]   ;;  %s632_s8 = inlined_call_operand.hbm [shape: f32[1,1,6], index: 8, kind: output, shape index: {0}]   ;;  %s633_s9 = inlined_call_operand.hbm [shape: f32[1,6], index: 9, kind: output, shape index: {1}]   ;;  %s634_s10 = inlined_call_operand.hbm [shape: f32[1,1,6], index: 10, kind: output, shape index: {2}]  }
   0x1   :  { %17 = vsyncpa [#allocation6], 0 }
   0x2   :  { %18 = vsyncpa [#allocation4], 0 }
   0x3   :  { %19 = vsyncpa [#allocation9], 0  ;;  %s460_s13 = smov [#allocation2]   ;;  %s461_s15 = smov [#allocation5]  }
   0x4   :  { %s26_s14 = sshll.u32 %s460_s13, 4  ;;  %s42_s16 = sshll.u32 %s461_s15, 4  ;;  %s27_s14 = int_to_ptr.vmem [resolvable:$true] %s26_s14  ;;  %s43_s16 = int_to_ptr.vmem [resolvable:$true] %s42_s16 }
   0x5   :  { %s342_s19 = scalar_lea.hbm %s624_s0, 16 }
   0x6   :  { %p343_p0 = scmp.ne.s32.totalorder %s624_s0, %s342_s19  ;;  %p346_p1 = scmp.lt.u32.totalorder %s342_s19, %s624_s0 }
   0x8   :  { %p348_p2 = pnand %p346_p1, %p343_p0 }
   0xa   :  { %351 = shalt.err (!%p348_p2)
}
   0xb   :  { %s352_s24 = scalar_lea.vmem %s27_s14, 16  ;;  %s356_s25 = scalar_lea.vmem %s27_s14, 32 }
   0xc   :  { %p353_p3 = scmp.ne.s32.totalorder %s27_s14, %s352_s24  ;;  %p357_p4 = scmp.lt.s32.totalorder %s27_s14, %s27_s14 }
   0xd   :  { %p358_p5 = scmp.lt.s32.totalorder %s356_s25, %s352_s24 }
   0xf   :  { %p359_p6 = por %p358_p5, %p357_p4 }
  0x11   :  { %p360_p7 = pnand %p359_p6, %p353_p3 }
  0x13   :  { %363 = shalt.err (!%p360_p7)
}
  0x14   :  { %29 = dma.hbm_to_vmem [thread:$0]  %s624_s0, 16, %s27_s14, [#allocation3]  }
  0x15   :  { %s364_s30 = scalar_lea.hbm %s628_s4, 128 }
  0x16   :  { %p365_p8 = scmp.ne.s32.totalorder %s628_s4, %s364_s30  ;;  %p368_p9 = scmp.lt.u32.totalorder %s364_s30, %s628_s4 }
  0x18   :  { %p370_p10 = pnand %p368_p9, %p365_p8 }
  0x1a   :  { %373 = shalt.err (!%p370_p10)
}
  0x1b   :  { %s374_s17 = scalar_lea.vmem %s43_s16, 128  ;;  %p379_p12 = scmp.lt.s32.totalorder %s43_s16, %s43_s16 }
  0x1c   :  { %p375_p11 = scmp.ne.s32.totalorder %s43_s16, %s374_s17  ;;  %p380_p13 = scmp.lt.s32.totalorder %s374_s17, %s374_s17 }
  0x1e   :  { %p381_p0 = por %p380_p13, %p379_p12 }
  0x20   :  { %p382_p1 = pnand %p381_p0, %p375_p11 }
  0x22   :  { %385 = shalt.err (!%p382_p1)
}
  0x23   :  { %45 = dma.hbm_to_vmem [thread:$0]  %s628_s4, 128, %s43_s16, [#allocation6]  }
  0x24   :  { %452 = dma.done.wait [#allocation3], 16  }
  0x25   :  { %453 = vsyncadd [#allocation3], 4294967280 }
  0x26   :  { %454 = dma.done.wait [#allocation6], 128  }
  0x27   :  { %455 = vsyncadd [#allocation6], 4294967168  ;;  %v462_v0 = vmov 0.0   ;;  %vm463_vm0 = vmmov 0   ;;  %vm67_vm1 = vcmask 1045504   ;;  %vm63_vm2 = vcmask 48128  }
  0x28   :  { %316 = vmatprep.subr.mxu0 %v462_v0  ;;  %321 = vmatprep.subr.mxu1 %v462_v0  ;;  %v62_v1 = vld [vmem:[#allocation5] sm:$0x3f]  ;;  %v61_v2 = vld [vmem:[%s627_s3] sm:$0x3f]  ;;  %v58_v4 = vld [vmem:[#allocation2] sm:$0x1]  ;;  %v246_v24 = vlaneseq }
  0x29   :  { %318 = vmatprep.mubr.msk.f32.mxu0 %vm463_vm0, %v462_v0  ;;  %323 = vmatprep.mubr.msk.f32.mxu1 %vm463_vm0, %v462_v0  ;;  %v59_v3 = vld [vmem:[%s625_s1] sm:$0x1]  ;;  %s464_s24 = smov 116   ;;  %s465_s26 = smov 6   ;;  %vm253_vm3 = vcmask 40960  }
  0x2a   :  { %317 = vmatpush3.msk.msra.mxu0 %vm67_vm1, %v62_v1  ;;  %322 = vmatpush3.msk.msra.mxu1 %vm67_vm1, %v61_v2  ;;  %v217_v7 = vld [vmem:[%s629_s5] sm:$0x1]  ;;  %v247_v25 = vshrl.u32 %v246_v24, 7  ;;  %s469_s27 = smov [#allocation8]   ;;  %s470_s29 = smov [#allocation7]  }
  0x2b   :  { %319 = vmatmul.mubr.msk.f32.vlgmr.msra.gmra.mrb[0].mxu0 %vm63_vm2, %v59_v3  ;;  %324 = vmatmul.mubr.msk.f32.vlgmr.msra.gmra.mrb[0].mxu1 %vm63_vm2, %v58_v4  ;;  %v220_v12 = vld [vmem:[%s630_s6] sm:$0x1]  ;;  %s466_s6 = smov 12   ;;  %s281_s28 = sshll.u32 %s469_s27, 4  ;;  %s282_s28 = int_to_ptr.vmem [resolvable:$true] %s281_s28 }
  0x2c   :  { %v222_v14 = vld [vmem:[%s631_s7] sm:$0x1]  ;;  %v248_v26 = vsub.s32 0, %v247_v25  ;;  %s467_s7 = smov 122   ;;  %s271_s30 = sshll.u32 %s470_s29, 4  ;;  %s570_s30 = int_to_ptr.vmem [resolvable:$true] %s271_s30 }
  0x2d   :  { %v60_v17 = vld [vmem:[%s626_s2] sm:$0x1]  ;;  %s468_s2 = smov 110   ;;  %s471_s11 = smov [#allocation10]  }
  0x2e   :  { %s291_s12 = sshll.u32 %s471_s11, 4  ;;  %s386_s13 = scalar_lea.vmem %s282_s28, 16  ;;  %s574_s12 = int_to_ptr.vmem [resolvable:$true] %s291_s12 }
  0x2f   :  { %p387_p2 = scmp.ne.s32.totalorder %s282_s28, %s386_s13  ;;  %s390_s15 = scalar_lea.vmem %s282_s28, 32 }
  0x30   :  { %p391_p3 = scmp.lt.s32.totalorder %s282_s28, %s282_s28  ;;  %p392_p4 = scmp.lt.s32.totalorder %s390_s15, %s386_s13 }
  0x32   :  { %p393_p5 = por %p392_p4, %p391_p3 }
  0x34   :  { %p394_p6 = pnand %p393_p5, %p387_p2 }
  0xfe   :  { %v137_v5 = vpop.f32.mrb[0].mxu0  ;;  %v213_v6 = vpop.f32.mrb[0].mxu1 }
  0xff   :  { %v214_v8 = vadd.f32 %v213_v6, %v137_v5  ;;  %v320_v9 = vpop.f32.mrb[1].mxu0  ;;  %v325_v10 = vpop.f32.mrb[1].mxu1 }
 0x101   :  { %v218_v11 = vadd.f32 %v217_v7, %v214_v8 }
 0x103   :  { %338 = vtanh.f32 %v218_v11 }
 0x10d   :  { %v339_v13 = vpop.eup %338 }
 0x10e   :  { %v221_v15 = vmul.f32 %v339_v13, %v220_v12 }
 0x110   :  { %v223_v16 = vadd.f32 %v222_v14, %v221_v15 }
 0x112   :  { %230 = vrot.lane.b32.xlu0 %v223_v16, %s464_s24 }
 0x116   :  { %225 = vrot.lane.b32.xlu0 %v60_v17, %s465_s26 }
 0x184   :  { %v231_v18 = vpop.permute.xlu0 %230 }
 0x185   :  { %v233_v19 = vmul.f32 %v231_v18, %v223_v16 }
 0x187   :  { %235 = vrot.lane.b32.xlu1 %v233_v19, %s465_s26 }
 0x188   :  { %v226_v20 = vpop.permute.xlu0 %225 }
 0x189   :  { %v228_v21 = vmul.f32 %v226_v20, %v223_v16 }
 0x1f9   :  { %v236_v22 = vpop.permute.xlu1 %235 }
 0x1fa   :  { %v238_v23 = vadd.f32 %v236_v22, %v228_v21 }
 0x1fc   :  { %340 = vtanh.f32 %v238_v23  ;;  %v259_v28 = vrot.slane %v238_v23, %v248_v26 }
 0x206   :  { %v341_v27 = vpop.eup %340 }
 0x207   :  { %241 = vrot.lane.b32.xlu1 %v341_v27, %s466_s6 }
 0x20b   :  { %260 = vrot.lane.b32.xlu1 %v259_v28, %s467_s7 }
 0x279   :  { %v242_v29 = vpop.permute.xlu1 %241 }
 0x27a   :  { %v244_v30 = vmul.f32 %v242_v29, %v223_v16 }
 0x27c   :  { %v249_v31 = vrot.slane %v244_v30, %v248_v26 }
 0x27d   :  { %v261_v32 = vpop.permute.xlu1 %260 }
 0x27e   :  { %263 = vst.msk [vmem:[#allocation10] sm:$0x1] %vm253_vm3, %v261_v32  ;;  %250 = vrot.lane.b32.xlu0 %v249_v31, %s468_s2 }
 0x2f0   :  { %v251_v33 = vpop.permute.xlu0 %250 }
 0x2f1   :  { %254 = vst.msk [vmem:[#allocation7] sm:$0x1] %vm253_vm3, %v251_v33  ;;  %264 = vst.msk [vmem:[#allocation8] sm:$0x1] %vm253_vm3, %v251_v33 }
 0x2f2   :  { %397 = shalt.err (!%p394_p6)
}
 0x2f3   :  { %s398_s14 = scalar_lea.hbm %s633_s9, 16 }
 0x2f4   :  { %p399_p7 = scmp.ne.s32.totalorder %s633_s9, %s398_s14  ;;  %p402_p8 = scmp.lt.u32.totalorder %s398_s14, %s633_s9 }
 0x2f6   :  { %p404_p9 = pnand %p402_p8, %p399_p7 }
 0x2f8   :  { %407 = shalt.err (!%p404_p9)
}
 0x2f9   :  { %284 = dma.vmem_to_hbm [thread:$0]  %s282_s28, 16, %s633_s9, [#allocation9]  }
 0x2fa   :  { %s408_s3 = scalar_lea.vmem %s570_s30, 16  ;;  %s412_s22 = scalar_lea.vmem %s570_s30, 32 }
 0x2fb   :  { %p409_p10 = scmp.ne.s32.totalorder %s570_s30, %s408_s3  ;;  %p413_p11 = scmp.lt.s32.totalorder %s570_s30, %s570_s30 }
 0x2fc   :  { %p414_p12 = scmp.lt.s32.totalorder %s412_s22, %s408_s3 }
 0x2fe   :  { %p415_p13 = por %p414_p12, %p413_p11 }
 0x300   :  { %p416_p0 = pnand %p415_p13, %p409_p10 }
 0x302   :  { %419 = shalt.err (!%p416_p0)
}
 0x303   :  { %s420_s24 = scalar_lea.hbm %s632_s8, 16 }
 0x304   :  { %p421_p1 = scmp.ne.s32.totalorder %s632_s8, %s420_s24  ;;  %p424_p2 = scmp.lt.u32.totalorder %s420_s24, %s632_s8 }
 0x306   :  { %p426_p3 = pnand %p424_p2, %p421_p1 }
 0x308   :  { %429 = shalt.err (!%p426_p3)
}
 0x309   :  { %274 = dma.vmem_to_hbm [thread:$0]  %s570_s30, 16, %s632_s8, [#allocation4]  }
 0x30a   :  { %s430_s2 = scalar_lea.vmem %s574_s12, 16  ;;  %s434_s27 = scalar_lea.vmem %s574_s12, 32 }
 0x30b   :  { %p431_p4 = scmp.ne.s32.totalorder %s574_s12, %s430_s2  ;;  %p435_p5 = scmp.lt.s32.totalorder %s574_s12, %s574_s12 }
 0x30c   :  { %p436_p6 = scmp.lt.s32.totalorder %s434_s27, %s430_s2 }
 0x30e   :  { %p437_p7 = por %p436_p6, %p435_p5 }
 0x310   :  { %p438_p8 = pnand %p437_p7, %p431_p4 }
 0x312   :  { %441 = shalt.err (!%p438_p8)
}
 0x313   :  { %s442_s11 = scalar_lea.hbm %s634_s10, 16 }
 0x314   :  { %p443_p9 = scmp.ne.s32.totalorder %s634_s10, %s442_s11  ;;  %p446_p10 = scmp.lt.u32.totalorder %s442_s11, %s634_s10 }
 0x316   :  { %p448_p11 = pnand %p446_p10, %p443_p9 }
 0x318   :  { %451 = shalt.err (!%p448_p11)
}
 0x319   :  { %294 = dma.vmem_to_hbm [thread:$0]  %s574_s12, 16, %s634_s10, [#allocation9]  }
 0x31a   :  { %456 = dma.done.wait [#allocation4], 16  }
 0x31b   :  { %457 = vsyncadd [#allocation4], 4294967280 }
 0x31c   :  { %458 = dma.done.wait [#allocation9], 32  }
 0x31d   :  { %459 = vsyncadd [#allocation9], 4294967264 }
 0x31e   :  { %304 = vsyncpa [#allocation3], 1 }
 0x31f   :  { %305 = vsyncpa [#allocation6], 1 }
 0x320   :  { %306 = vsyncpa [#allocation4], 1 }
 0x321   :  { %307 = vsyncpa [#allocation9], 1 }

</bundles_post_ra>
